<compile_context>
chip_gen: v7x
topology: tpu7x:2x2x1
jax: 0.10.0
libtpu: 0.0.40
codegen_flags: <defaults>
</compile_context>

<pallas_src>
import jax
import jax.numpy as jnp
from jax.experimental import pallas as pl
from jax.experimental.pallas import tpu as pltpu


def predictor_kernel(x_ref, w1_ref, b1_ref, w2r_ref, b2_ref, o_ref):
    # ---- Layer 1 on the MXU: bf16 operands, f32 accumulation ----
    xb = x_ref[...].astype(jnp.bfloat16)          # (TILE_B, dim)
    w1b = w1_ref[...].astype(jnp.bfloat16)        # (dim, hidden)
    h = jnp.dot(xb, w1b, preferred_element_type=jnp.float32)   # (TILE_B, hidden) f32
    # Bias + ReLU in f32 on the VPU (Dropout is identity at inference).
    h = jnp.maximum(h + b1_ref[...], 0.0)
    # ---- Layer 2 (output width 1) off the MXU: VPU multiply + lane reduction ----
    # w2r_ref is the second-layer weight pre-reshaped to (1, hidden) in the wrapper.
    o = jnp.sum(h * w2r_ref[...], axis=-1, keepdims=True)      # (TILE_B, 1)
    o = o + b2_ref[0, 0]                                        # scalar bias from SMEM
    o_ref[...] = o.astype(o_ref.dtype)


def _pick_tile_b(B, dim, hidden, vmem_budget_bytes):
    """Pick a batch tile that fits comfortably in the scoped-VMEM budget."""
    # Rough per-row VMEM footprint: double-buffered f32 feats + bf16 copy,
    # f32 hidden activations (+ headroom), double-buffered output column.
    per_row = 10 * dim + 6 * hidden + 16
    cap = max(8, (vmem_budget_bytes // 2) // per_row)
    tile = min(512, cap, ((B + 7) // 8) * 8)   # 512 rows ~ HBM-roofline sweet spot (v6e)
    return max(8, (tile // 8) * 8)


def predictor_forward(feats, w1, b1, w2, b2, *, tile_b=None, vmem_limit_bytes=32 << 20):
    B, dim = feats.shape
    hidden = w1.shape[1]
    assert w1.shape == (dim, hidden)
    assert b1.shape == (1, hidden)
    assert w2.shape == (hidden, 1)
    assert b2.shape == (1, 1)

    if tile_b is None:
        tile_b = _pick_tile_b(B, dim, hidden, vmem_limit_bytes)
    num_tiles = pl.cdiv(B, tile_b)
    b_pad = num_tiles * tile_b
    if b_pad != B:
        feats = jnp.pad(feats, ((0, b_pad - B), (0, 0)))

    # Present the (hidden, 1) second-layer weight as a lane-dense (1, hidden) row so the
    # kernel can do a broadcast-multiply + lane reduction (no in-kernel relayout needed).
    w2_row = w2.reshape(1, hidden)

    out = pl.pallas_call(
        predictor_kernel,
        out_shape=jax.ShapeDtypeStruct((b_pad, 1), feats.dtype),
        grid=(num_tiles,),
        in_specs=[
            pl.BlockSpec((tile_b, dim), lambda i: (i, 0)),              # batch-tiled input
            pl.BlockSpec((dim, hidden), lambda i: (0, 0)),              # resident weights
            pl.BlockSpec((1, hidden), lambda i: (0, 0)),                # resident bias 1
            pl.BlockSpec((1, hidden), lambda i: (0, 0)),                # resident w2 row
            pl.BlockSpec(memory_space=pltpu.MemorySpace.SMEM),          # scalar bias 2
        ],
        out_specs=pl.BlockSpec((tile_b, 1), lambda i: (i, 0)),
        compiler_params=pltpu.CompilerParams(
            dimension_semantics=("parallel",),
            vmem_limit_bytes=vmem_limit_bytes,
        ),
    )(feats, w1, b1, w2_row, b2)
    return out[:B]


def init_predictor_params(key, dim, dtype=jnp.float32):
    """Deterministic init mimicking nn.Linear default (U(-1/sqrt(fan_in), 1/sqrt(fan_in)))."""
    k1, k2, k3, k4 = jax.random.split(key, 4)
    hidden = dim * 2
    bound1 = 1.0 / jnp.sqrt(dim)
    bound2 = 1.0 / jnp.sqrt(hidden)
    w1 = jax.random.uniform(k1, (dim, hidden), dtype, -bound1, bound1)
    b1 = jax.random.uniform(k2, (1, hidden), dtype, -bound1, bound1)
    w2 = jax.random.uniform(k3, (hidden, 1), dtype, -bound2, bound2)
    b2 = jax.random.uniform(k4, (1, 1), dtype, -bound2, bound2)
    return w1, b1, w2, b2


if __name__ == "__main__":
    key = jax.random.PRNGKey(0)
    k_feats, k_params = jax.random.split(key)

    # Small shapes consistent with the module; B deliberately not a multiple of 8
    # to exercise the padding path.
    B, dim = 20, 32
    feats = jax.random.normal(k_feats, (B, dim), jnp.float32)
    w1, b1, w2, b2 = init_predictor_params(k_params, dim)

    # Pure-JAX reference (dropout = identity at inference).
    ref = jnp.maximum(feats @ w1 + b1, 0.0) @ w2 + b2

    # 1) Default tile (single grid step for this tiny B).
    out = jax.block_until_ready(predictor_forward(feats, w1, b1, w2, b2))
    assert out.shape == (B, 1)
    assert jnp.allclose(out, ref, atol=1e-2, rtol=1e-2), "default-tile mismatch"

    # 2) Forced small tile to exercise the multi-step batch grid + resident weights.
    out2 = jax.block_until_ready(predictor_forward(feats, w1, b1, w2, b2, tile_b=8))
    assert out2.shape == (B, 1)
    assert jnp.allclose(out2, ref, atol=1e-2, rtol=1e-2), "tiled mismatch"

    print("KERNEL_OK")
</pallas_src>

<mosaic_0001>
module attributes {stable_mosaic.version = 11 : i64} {
  func.func @predictor_kernel(%arg0: i32, %arg1: memref<24x32xf32, #tpu.memory_space<vmem>>, %arg2: memref<32x64xf32, #tpu.memory_space<vmem>>, %arg3: memref<1x64xf32, #tpu.memory_space<vmem>>, %arg4: memref<1x64xf32, #tpu.memory_space<vmem>>, %arg5: memref<1x1xf32, #tpu.memory_space<smem>>, %arg6: memref<24x1xf32, #tpu.memory_space<vmem>>) attributes {dimension_semantics = [#tpu.dimension_semantics<parallel>], iteration_bounds = array<i64: 1>, scalar_prefetch = 0 : i64, scratch_operands = 0 : i64, tpu.core_type = #tpu.core_type<tc>, window_params = [{transform_indices = @transform_0, window_bounds = array<i64: 24, 32>}, {pipeline_mode = #tpu.pipeline_mode<synchronous>, transform_indices = @transform_1, window_bounds = array<i64: 32, 64>}, {pipeline_mode = #tpu.pipeline_mode<synchronous>, transform_indices = @transform_2, window_bounds = array<i64: 1, 64>}, {pipeline_mode = #tpu.pipeline_mode<synchronous>, transform_indices = @transform_3, window_bounds = array<i64: 1, 64>}, {transform_indices = @transform_4, window_bounds = array<i64: 1, 1>}, {transform_indices = @transform_5, window_bounds = array<i64: 24, 1>}]} {
    %c0 = arith.constant 0 : index
    %c0_0 = arith.constant 0 : index
    %0 = vector.load %arg1[%c0, %c0_0] : memref<24x32xf32, #tpu.memory_space<vmem>>, vector<24x32xf32>
    %1 = arith.truncf %0 : vector<24x32xf32> to vector<24x32xbf16>
    %c0_1 = arith.constant 0 : index
    %c0_2 = arith.constant 0 : index
    %2 = vector.load %arg2[%c0_1, %c0_2] : memref<32x64xf32, #tpu.memory_space<vmem>>, vector<32x64xf32>
    %3 = arith.truncf %2 : vector<32x64xf32> to vector<32x64xbf16>
    %cst = arith.constant dense<0.000000e+00> : vector<24x64xf32>
    %4 = tpu.matmul %1, %3, %cst {dimension_numbers = #tpu.dot_dimension_numbers<[1], [0], [0], [1], [0, 0, 1, 1], [], []>} : vector<24x32xbf16>, vector<32x64xbf16>, vector<24x64xf32> -> vector<24x64xf32>
    %c0_3 = arith.constant 0 : index
    %c0_4 = arith.constant 0 : index
    %5 = vector.load %arg3[%c0_3, %c0_4] : memref<1x64xf32, #tpu.memory_space<vmem>>, vector<1x64xf32>
    %6 = vector.broadcast %5 : vector<1x64xf32> to vector<24x64xf32>
    %7 = arith.addf %4, %6 : vector<24x64xf32>
    %cst_5 = arith.constant 0.000000e+00 : f32
    %8 = vector.broadcast %cst_5 : f32 to vector<24x64xf32>
    %9 = arith.maximumf %7, %8 : vector<24x64xf32>
    %c0_6 = arith.constant 0 : index
    %c0_7 = arith.constant 0 : index
    %10 = vector.load %arg4[%c0_6, %c0_7] : memref<1x64xf32, #tpu.memory_space<vmem>>, vector<1x64xf32>
    %11 = vector.broadcast %10 : vector<1x64xf32> to vector<24x64xf32>
    %12 = arith.mulf %9, %11 : vector<24x64xf32>
    %cst_8 = arith.constant dense<0.000000e+00> : vector<24xf32>
    %13 = vector.multi_reduction <add>, %12, %cst_8 [1] : vector<24x64xf32> to vector<24xf32>
    %14 = vector.shape_cast %13 : vector<24xf32> to vector<24x1xf32>
    %c0_9 = arith.constant 0 : index
    %c0_10 = arith.constant 0 : index
    %15 = memref.load %arg5[%c0_9, %c0_10] : memref<1x1xf32, #tpu.memory_space<smem>>
    %16 = vector.broadcast %15 : f32 to vector<24x1xf32>
    %17 = arith.addf %14, %16 : vector<24x1xf32>
    %c0_11 = arith.constant 0 : index
    %c0_12 = arith.constant 0 : index
    %18 = vector.load %arg6[%c0_11, %c0_12] : memref<24x1xf32, #tpu.memory_space<vmem>>, vector<24x1xf32>
    tpu.vector_store %arg6[%c0_11, %c0_12], %17 {strides = array<i32>} : memref<24x1xf32, #tpu.memory_space<vmem>>, vector<24x1xf32>,
    return
  }
  func.func @transform_0(%arg0: i32) -> (i32, i32) {
    %c0_i32 = arith.constant 0 : i32
    %c0_i32_0 = arith.constant 0 : i32
    return %arg0, %c0_i32 : i32, i32
  }
  func.func @transform_1(%arg0: i32) -> (i32, i32) {
    %c0_i32 = arith.constant 0 : i32
    %c0_i32_0 = arith.constant 0 : i32
    %c0_i32_1 = arith.constant 0 : i32
    return %c0_i32, %c0_i32_0 : i32, i32
  }
  func.func @transform_2(%arg0: i32) -> (i32, i32) {
    %c0_i32 = arith.constant 0 : i32
    %c0_i32_0 = arith.constant 0 : i32
    %c0_i32_1 = arith.constant 0 : i32
    return %c0_i32, %c0_i32_0 : i32, i32
  }
  func.func @transform_3(%arg0: i32) -> (i32, i32) {
    %c0_i32 = arith.constant 0 : i32
    %c0_i32_0 = arith.constant 0 : i32
    %c0_i32_1 = arith.constant 0 : i32
    return %c0_i32, %c0_i32_0 : i32, i32
  }
  func.func @transform_4(%arg0: i32) -> (i32, i32) {
    %c0_i32 = arith.constant 0 : i32
    %c0_i32_0 = arith.constant 0 : i32
    %c0_i32_1 = arith.constant 0 : i32
    return %c0_i32, %c0_i32_0 : i32, i32
  }
  func.func @transform_5(%arg0: i32) -> (i32, i32) {
    %c0_i32 = arith.constant 0 : i32
    %c0_i32_0 = arith.constant 0 : i32
    return %arg0, %c0_i32 : i32, i32
  }
}

</mosaic_0001>

<bundles_post_ra>
// kernel: tpu_custom_call.1
= control target key start
LH: loop header
LB: loop body
LE: loop exit
PB: predicated region body
PF: predicated region fallthrough
CT: control target
= control target key end

     0   :  { %11 = vsyncpa [#allocation4], 0  ;;  %s305_s0 = inlined_call_operand.hbm [shape: f32[24,32], index: 0, kind: input, shape index: {}]   ;;  %s306_s1 = inlined_call_operand.hbm [shape: f32[32,64], index: 1, kind: input, shape index: {}]   ;;  %s307_s2 = inlined_call_operand.vmem [shape: f32[1,64], index: 2, kind: input, shape index: {}]   ;;  %s308_s3 = inlined_call_operand.vmem [shape: f32[1,64], index: 3, kind: input, shape index: {}]   ;;  %s309_s4 = inlined_call_operand.<no memory space> [shape: f32[1,1], index: 4, kind: input, shape index: {}]   ;;  %s310_s5 = inlined_call_operand.vmem [shape: f32[24,1], index: 5, kind: output, shape index: {}]  }
   0x1   :  { %12 = vsyncpa [#allocation6], 0  ;;  %s229_s18 = smov [#allocation3]   ;;  %s181_s22 = scalar_lea.hbm %s305_s0, 384 }
   0x2   :  { %s18_s19 = sshll.u32 %s229_s18, 4  ;;  %p182_p0 = scmp.ne.s32.totalorder %s305_s0, %s181_s22  ;;  %s19_s19 = int_to_ptr.vmem [resolvable:$true] %s18_s19 }
   0x3   :  { %p185_p1 = scmp.lt.u32.totalorder %s181_s22, %s305_s0 }
   0x5   :  { %p187_p2 = pnand %p185_p1, %p182_p0 }
   0x7   :  { %190 = shalt.err (!%p187_p2)
}
   0x8   :  { %s191_s27 = scalar_lea.vmem %s19_s19, 384  ;;  %p196_p4 = scmp.lt.s32.totalorder %s19_s19, %s19_s19 }
   0x9   :  { %p192_p3 = scmp.ne.s32.totalorder %s19_s19, %s191_s27  ;;  %p197_p5 = scmp.lt.s32.totalorder %s191_s27, %s191_s27 }
   0xb   :  { %p198_p6 = por %p197_p5, %p196_p4 }
   0xd   :  { %p199_p7 = pnand %p198_p6, %p192_p3 }
   0xf   :  { %202 = shalt.err (!%p199_p7)
}
  0x10   :  { %s230_s28 = smov 128   ;;  %s231_s29 = smov 8  }
  0x11   :  { %24 = dma.hbm_to_vmem [thread:$0]  %s305_s0, 384, %s19_s19, [#allocation4], %s230_s28, %s230_s28, %s231_s29  }
  0x12   :  { %s232_s7 = smov [#allocation5]   ;;  %s203_s11 = scalar_lea.hbm %s306_s1, 512 }
  0x13   :  { %s30_s8 = sshll.u32 %s232_s7, 4  ;;  %p204_p8 = scmp.ne.s32.totalorder %s306_s1, %s203_s11  ;;  %s31_s8 = int_to_ptr.vmem [resolvable:$true] %s30_s8 }
  0x14   :  { %p207_p9 = scmp.lt.u32.totalorder %s203_s11, %s306_s1 }
  0x16   :  { %p209_p10 = pnand %p207_p9, %p204_p8 }
  0x18   :  { %212 = shalt.err (!%p209_p10)
}
  0x19   :  { %s213_s16 = scalar_lea.vmem %s31_s8, 512  ;;  %p218_p12 = scmp.lt.s32.totalorder %s31_s8, %s31_s8 }
  0x1a   :  { %p214_p11 = scmp.ne.s32.totalorder %s31_s8, %s213_s16  ;;  %p219_p13 = scmp.lt.s32.totalorder %s213_s16, %s213_s16 }
  0x1c   :  { %p220_p0 = por %p219_p13, %p218_p12 }
  0x1e   :  { %p221_p1 = pnand %p220_p0, %p214_p11 }
  0x20   :  { %224 = shalt.err (!%p221_p1)
}
  0x21   :  { %36 = dma.hbm_to_vmem [thread:$0]  %s306_s1, 512, %s31_s8, [#allocation6], %s230_s28, %s230_s28, %s231_s29  }
  0x22   :  { %225 = dma.done.wait [#allocation4], 384  }
  0x23   :  { %226 = vsyncadd [#allocation4], 4294966912 }
  0x24   :  { %227 = dma.done.wait [#allocation6], 512  }
  0x25   :  { %228 = vsyncadd [#allocation6], 4294966784  ;;  %v55_v0 = vld [vmem:[#allocation5] sm:$0xff]  ;;  %v56_v1 = vld [vmem:[#allocation5 + $0x8] sm:$0xff]  ;;  %vm68_vm0 = vcmask 261120   ;;  %vm136_vm1 = vcmask 523264   ;;  %v147_v29 = vstv %s309_s4 }
  0x26   :  { %v57_v2 = vld [vmem:[#allocation5 + $0x10] sm:$0xff]  ;;  %v59_v3 = vpack.c.bf16 %v56_v1, %v55_v0  ;;  %v58_v4 = vld [vmem:[#allocation5 + $0x18] sm:$0xff]  ;;  %v50_v5 = vld [vmem:[#allocation3] sm:$0xff]  ;;  %vm151_vm2 = vcmask 7168  }
  0x27   :  { %v51_v6 = vld [vmem:[#allocation3 + $0x8] sm:$0xff]  ;;  %v60_v7 = vpack.c.bf16 %v58_v4, %v57_v2  ;;  %v52_v9 = vld [vmem:[#allocation3 + $0x10] sm:$0xff]  ;;  %v161_v11 = vld [vmem:[%s307_s2] ss:$0 sm:$0xff] }
  0x28   :  { %v53_v8 = vpack.c.bf16 %v51_v6, %v50_v5  ;;  %169 = vmatprep.subr.bf16.mxu0 %v59_v3  ;;  %v54_v10 = vpack.c.bf16 %v52_v9, %v52_v9  ;;  %v164_v17 = vld [vmem:[%s308_s3] ss:$0 sm:$0xff] }
  0x29   :  { %170 = vmatpush3.bf16.msra.mxu0 %v59_v3 }
  0x2a   :  { %173 = vmatprep.mubr.msk.bf16.mxu0 %vm68_vm0, %v53_v8  ;;  %171 = vmatprep.subr.bf16.mxu0 %v60_v7 }
  0x2d   :  { %172 = vmatpush3.bf16.msra.mxu0 %v60_v7 }
  0x30   :  { %174 = vmatmul.mubr.msk.bf16.vlgmr.msra.gmra.mrb[0].mxu0 %vm68_vm0, %v54_v10 }
 0x103   :  { %v175_v12 = vpop.f32.mrb[0].mxu0 }
 0x104   :  { %v118_v13 = vadd.f32 %v175_v12, %v161_v11  ;;  %v109_v14 = vpop.f32.mrb[1].mxu0 }
 0x105   :  { %v110_v15 = vadd.f32 %v161_v11, %v109_v14  ;;  %v176_v16 = vpop.f32.mrb[2].mxu0 }
 0x106   :  { %v125_v18 = vmax.f32 %v118_v13, 0.0  ;;  %v112_v19 = vpop.f32.mrb[3].mxu0 }
 0x107   :  { %v123_v20 = vmax.f32 %v110_v15, 0.0  ;;  %v113_v21 = vadd.f32 %v161_v11, %v112_v19 }
 0x108   :  { %v135_v22 = vmul.f32 %v164_v17, %v125_v18 }
 0x109   :  { %v124_v23 = vmax.f32 %v113_v21, 0.0  ;;  %v133_v24 = vmul.f32 %v164_v17, %v123_v20 }
 0x10a   :  { %v143_v25 = vsel %vm136_vm1, %v135_v22, 0.0 }
 0x10b   :  { %144 = vadd.xlane.f32.xlu1 %v143_v25  ;;  %v137_v26 = vsel %vm136_vm1, %v133_v24, 0.0  ;;  %v134_v27 = vmul.f32 %v164_v17, %v124_v23 }
 0x10c   :  { %138 = vadd.xlane.f32.xlu0 %v137_v26 }
 0x10d   :  { %v140_v28 = vsel %vm136_vm1, %v134_v27, 0.0 }
 0x110   :  { %141 = vadd.xlane.f32.xlu0 %v140_v28 }
 0x198   :  { %v145_v30 = vpop.xlane.xlu1 %144 }
 0x199   :  { %v150_v31 = vadd.f32 %v147_v29, %v145_v30  ;;  %v139_v32 = vpop.xlane.xlu0 %138 }
 0x19a   :  { %v148_v33 = vadd.f32 %v147_v29, %v139_v32 }
 0x19b   :  { %154 = vst.msk [vmem:[%s310_s5 + $0x10] sm:$0xff] %vm151_vm2, %v150_v31 }
 0x19c   :  { %152 = vst.msk [vmem:[%s310_s5] sm:$0xff] %vm151_vm2, %v148_v33 }
 0x19d   :  { %v142_v34 = vpop.xlane.xlu0 %141 }
 0x19e   :  { %v149_v35 = vadd.f32 %v147_v29, %v142_v34 }
 0x1a0   :  { %153 = vst.msk [vmem:[%s310_s5 + $0x8] sm:$0xff] %vm151_vm2, %v149_v35 }
 0x1a1   :  { %159 = vsyncpa [#allocation4], 1 }
 0x1a2   :  { %160 = vsyncpa [#allocation6], 1 }

</bundles_post_ra>
